<compile_context>
chip_gen: v7x
topology: tpu7x:2x2x1
jax: 0.10.0
libtpu: 0.0.40
codegen_flags: <defaults>
</compile_context>

<pallas_src>
import functools

import jax
import jax.numpy as jnp
from jax.experimental import pallas as pl
from jax.experimental.pallas import tpu as pltpu


def _round_up(x: int, m: int) -> int:
    return (x + m - 1) // m * m


def _resblock_kernel(x_ref, w_ref, o_ref, *, num_layers: int):
    """One tile of tokens: x <- x + SiLU(x @ W_l) for each layer l.

    x_ref: (tm, Hp) activations (input dtype)
    w_ref: (L, Hp, Hp) bf16, already transposed to [H_in, H_out]
    o_ref: (tm, Hp)
    """
    x = x_ref[...].astype(jnp.float32)                 # running residual, f32
    for l in range(num_layers):                        # static, small L
        # MXU path: bf16 x bf16 -> f32 accumulate; RHS contracted on dim 0
        # (pre-transposed on host), so no in-kernel relayout.
        h = jax.lax.dot_general(
            x.astype(jnp.bfloat16), w_ref[l],
            dimension_numbers=(((1,), (0,)), ((), ())),
            preferred_element_type=jnp.float32,
        )                                              # (tm, Hp) f32
        x = x + h * jax.nn.sigmoid(h)                  # SiLU epilogue in f32
    o_ref[...] = x.astype(o_ref.dtype)


def _make_call(Mp, Hp, L, tm, out_dtype, *, single_buffer_weights):
    w_spec_kwargs = {}
    if single_buffer_weights and hasattr(pl, "Buffered"):
        # Constant index_map -> the weight block is fetched exactly once;
        # no need for a second (double) buffer in VMEM.
        w_spec_kwargs = dict(pipeline_mode=pl.Buffered(1))
    w_spec = pl.BlockSpec((L, Hp, Hp), lambda i: (0, 0, 0), **w_spec_kwargs)

    # VMEM budget: weight buffers (bf16) + double-buffered in/out activation
    # tiles + slack. Clamp into a sane range for all of v5e/v6e/v7x.
    w_bufs = 1 if single_buffer_weights else 2
    act_bytes = tm * Hp * jnp.dtype(out_dtype).itemsize
    need = w_bufs * L * Hp * Hp * 2 + 4 * act_bytes + (4 << 20)
    vmem_limit = int(min(max(need, 16 << 20), 100 << 20))

    kernel = functools.partial(_resblock_kernel, num_layers=L)
    return pl.pallas_call(
        kernel,
        out_shape=jax.ShapeDtypeStruct((Mp, Hp), out_dtype),
        grid_spec=pltpu.PrefetchScalarGridSpec(
            num_scalar_prefetch=0,
            grid=(Mp // tm,),
            in_specs=[
                pl.BlockSpec((tm, Hp), lambda i: (i, 0)),   # token tile
                w_spec,                                      # full weight stack
            ],
            out_specs=pl.BlockSpec((tm, Hp), lambda i: (i, 0)),
        ),
        compiler_params=pltpu.CompilerParams(
            dimension_semantics=("parallel",),               # shard tokens across TCs
            vmem_limit_bytes=vmem_limit,
        ),
    )


def resblock_forward(x: jax.Array, w: jax.Array, *, tm: int = 256) -> jax.Array:
    """x: (M, H) activations; w: (L, H, H) stacked nn.Linear weights
    (PyTorch layout: W[l] is [H_out, H_in])."""
    M, H = x.shape
    L = w.shape[0]
    assert w.shape == (L, H, H)

    # Tile/pad: tokens to a multiple of tm (bigger tiles amortize the ~0.35us
    # per-grid-step overhead), hidden to a multiple of 128 (lane-dense).
    tm = max(8, min(tm, _round_up(M, 8)))
    Mp = _round_up(M, tm)
    Hp = _round_up(H, 128)

    x_pad = jnp.pad(x, ((0, Mp - M), (0, Hp - H)))
    # [L, H_out, H_in] -> [L, H_in, H_out], pad, and ship in bf16.
    w_t = jnp.swapaxes(w, 1, 2)
    w_t = jnp.pad(w_t, ((0, 0), (0, Hp - H), (0, Hp - H))).astype(jnp.bfloat16)

    out, err = None, None
    for single_buf in (True, False):
        try:
            call = _make_call(Mp, Hp, L, tm, x.dtype,
                              single_buffer_weights=single_buf)
            out = jax.block_until_ready(call(x_pad, w_t))
            break
        except Exception as e:  # pl.Buffered(1)/pipeline_mode unsupported -> retry
            err = e
            out = None
    if out is None:
        raise err
    return out[:M, :H]

    # TODO(synk): for very large H (bf16 weights exceeding ~half of VMEM,
    # esp. v7x's 64 MiB/TC), stream W per-layer with an inner
    # pltpu.emit_pipeline instead of keeping the full stack resident.


def _reference(x, w):
    """Pure-JAX f32 reference mirroring the PyTorch forward."""
    x = x.astype(jnp.float32)
    for l in range(w.shape[0]):
        h = x @ w[l].T
        x = x + jax.nn.silu(h)
    return x


if __name__ == "__main__":
    # Small shapes consistent with the module: batch=2, seq=8, hidden=32,
    # num_layers=2 -> tokens flattened to (M, H).
    batch, seq, hidden, num_layers = 2, 8, 32, 2
    M = batch * seq

    key = jax.random.PRNGKey(0)
    kx, kw = jax.random.split(key)
    x = jax.random.normal(kx, (M, hidden), dtype=jnp.float32)
    # Deterministic init roughly matching nn.Linear's U(-1/sqrt(H), 1/sqrt(H)).
    bound = 1.0 / (hidden ** 0.5)
    w = jax.random.uniform(
        kw, (num_layers, hidden, hidden), dtype=jnp.float32,
        minval=-bound, maxval=bound,
    )

    out = resblock_forward(x, w)
    out = jax.block_until_ready(out)

    ref = _reference(x, w)
    assert out.shape == (M, hidden)
    # bf16 MXU inputs with f32 accumulation -> compare at bf16-level tolerance.
    assert jnp.allclose(out, ref, atol=2e-2, rtol=2e-2), (
        float(jnp.max(jnp.abs(out - ref))))

    print("KERNEL_OK")
</pallas_src>

<mosaic_0001>
module attributes {stable_mosaic.version = 11 : i64} {
  func.func @_resblock_kernel(%arg0: i32, %arg1: memref<16x128xf32, #tpu.memory_space<vmem>>, %arg2: memref<2x128x128xbf16, #tpu.memory_space<vmem>>, %arg3: memref<16x128xf32, #tpu.memory_space<vmem>>) attributes {dimension_semantics = [#tpu.dimension_semantics<parallel>], iteration_bounds = array<i64: 1>, scalar_prefetch = 0 : i64, scratch_operands = 0 : i64, tpu.core_type = #tpu.core_type<tc>, window_params = [{transform_indices = @transform_0, window_bounds = array<i64: 16, 128>}, {pipeline_mode = #tpu.pipeline_mode<synchronous>, transform_indices = @transform_1, window_bounds = array<i64: 2, 128, 128>}, {transform_indices = @transform_2, window_bounds = array<i64: 16, 128>}]} {
    %c0 = arith.constant 0 : index
    %c0_0 = arith.constant 0 : index
    %0 = vector.load %arg1[%c0, %c0_0] : memref<16x128xf32, #tpu.memory_space<vmem>>, vector<16x128xf32>
    %1 = arith.truncf %0 : vector<16x128xf32> to vector<16x128xbf16>
    %c0_1 = arith.constant 0 : index
    %c0_2 = arith.constant 0 : index
    %c0_3 = arith.constant 0 : index
    %2 = vector.load %arg2[%c0_1, %c0_2, %c0_3] : memref<2x128x128xbf16, #tpu.memory_space<vmem>>, vector<1x128x128xbf16>
    %3 = vector.shape_cast %2 : vector<1x128x128xbf16> to vector<128x128xbf16>
    %cst = arith.constant dense<0.000000e+00> : vector<16x128xf32>
    %4 = tpu.matmul %1, %3, %cst {dimension_numbers = #tpu.dot_dimension_numbers<[1], [0], [0], [1], [0, 0, 1, 1], [], []>} : vector<16x128xbf16>, vector<128x128xbf16>, vector<16x128xf32> -> vector<16x128xf32>
    %5 = arith.negf %4 : vector<16x128xf32>
    %6 = math.exp %5 : vector<16x128xf32>
    %cst_4 = arith.constant 1.000000e+00 : f32
    %7 = vector.broadcast %cst_4 : f32 to vector<16x128xf32>
    %8 = arith.addf %7, %6 : vector<16x128xf32>
    %9 = arith.divf %7, %8 : vector<16x128xf32>
    %10 = arith.mulf %4, %9 : vector<16x128xf32>
    %11 = arith.addf %0, %10 : vector<16x128xf32>
    %12 = arith.truncf %11 : vector<16x128xf32> to vector<16x128xbf16>
    %c1 = arith.constant 1 : index
    %c0_5 = arith.constant 0 : index
    %c0_6 = arith.constant 0 : index
    %13 = vector.load %arg2[%c1, %c0_5, %c0_6] : memref<2x128x128xbf16, #tpu.memory_space<vmem>>, vector<1x128x128xbf16>
    %14 = vector.shape_cast %13 : vector<1x128x128xbf16> to vector<128x128xbf16>
    %cst_7 = arith.constant dense<0.000000e+00> : vector<16x128xf32>
    %15 = tpu.matmul %12, %14, %cst_7 {dimension_numbers = #tpu.dot_dimension_numbers<[1], [0], [0], [1], [0, 0, 1, 1], [], []>} : vector<16x128xbf16>, vector<128x128xbf16>, vector<16x128xf32> -> vector<16x128xf32>
    %16 = arith.negf %15 : vector<16x128xf32>
    %17 = math.exp %16 : vector<16x128xf32>
    %cst_8 = arith.constant 1.000000e+00 : f32
    %18 = vector.broadcast %cst_8 : f32 to vector<16x128xf32>
    %19 = arith.addf %18, %17 : vector<16x128xf32>
    %20 = arith.divf %18, %19 : vector<16x128xf32>
    %21 = arith.mulf %15, %20 : vector<16x128xf32>
    %22 = arith.addf %11, %21 : vector<16x128xf32>
    %c0_9 = arith.constant 0 : index
    %c0_10 = arith.constant 0 : index
    %23 = vector.load %arg3[%c0_9, %c0_10] : memref<16x128xf32, #tpu.memory_space<vmem>>, vector<16x128xf32>
    tpu.vector_store %arg3[%c0_9, %c0_10], %22 {strides = array<i32>} : memref<16x128xf32, #tpu.memory_space<vmem>>, vector<16x128xf32>,
    return
  }
  func.func @transform_0(%arg0: i32) -> (i32, i32) {
    %c0_i32 = arith.constant 0 : i32
    %c0_i32_0 = arith.constant 0 : i32
    return %arg0, %c0_i32 : i32, i32
  }
  func.func @transform_1(%arg0: i32) -> (i32, i32, i32) {
    %c0_i32 = arith.constant 0 : i32
    %c0_i32_0 = arith.constant 0 : i32
    %c0_i32_1 = arith.constant 0 : i32
    %c0_i32_2 = arith.constant 0 : i32
    return %c0_i32, %c0_i32_0, %c0_i32_1 : i32, i32, i32
  }
  func.func @transform_2(%arg0: i32) -> (i32, i32) {
    %c0_i32 = arith.constant 0 : i32
    %c0_i32_0 = arith.constant 0 : i32
    return %arg0, %c0_i32 : i32, i32
  }
}

module attributes {stable_mosaic.version = 11 : i64} {
  func.func @_resblock_kernel(%arg0: i32, %arg1: memref<16x128xf32, #tpu.memory_space<vmem>>, %arg2: memref<2x128x128xbf16, #tpu.memory_space<vmem>>, %arg3: memref<16x128xf32, #tpu.memory_space<vmem>>) attributes {dimension_semantics = [#tpu.dimension_semantics<parallel>], iteration_bounds = array<i64: 1>, scalar_prefetch = 0 : i64, scratch_operands = 0 : i64, tpu.core_type = #tpu.core_type<tc>, window_params = [{transform_indices = @transform_0, window_bounds = array<i64: 16, 128>}, {pipeline_mode = #tpu.pipeline_mode<synchronous>, transform_indices = @transform_1, window_bounds = array<i64: 2, 128, 128>}, {transform_indices = @transform_2, window_bounds = array<i64: 16, 128>}]} {
    %c0 = arith.constant 0 : index
    %c0_0 = arith.constant 0 : index
    %0 = vector.load %arg1[%c0, %c0_0] : memref<16x128xf32, #tpu.memory_space<vmem>>, vector<16x128xf32>
    %1 = arith.truncf %0 : vector<16x128xf32> to vector<16x128xbf16>
    %c0_1 = arith.constant 0 : index
    %c0_2 = arith.constant 0 : index
    %c0_3 = arith.constant 0 : index
    %2 = vector.load %arg2[%c0_1, %c0_2, %c0_3] : memref<2x128x128xbf16, #tpu.memory_space<vmem>>, vector<1x128x128xbf16>
    %3 = vector.shape_cast %2 : vector<1x128x128xbf16> to vector<128x128xbf16>
    %cst = arith.constant dense<0.000000e+00> : vector<16x128xf32>
    %4 = tpu.matmul %1, %3, %cst {dimension_numbers = #tpu.dot_dimension_numbers<[1], [0], [0], [1], [0, 0, 1, 1], [], []>} : vector<16x128xbf16>, vector<128x128xbf16>, vector<16x128xf32> -> vector<16x128xf32>
    %5 = arith.negf %4 : vector<16x128xf32>
    %6 = math.exp %5 : vector<16x128xf32>
    %cst_4 = arith.constant 1.000000e+00 : f32
    %7 = vector.broadcast %cst_4 : f32 to vector<16x128xf32>
    %8 = arith.addf %7, %6 : vector<16x128xf32>
    %9 = arith.divf %7, %8 : vector<16x128xf32>
    %10 = arith.mulf %4, %9 : vector<16x128xf32>
    %11 = arith.addf %0, %10 : vector<16x128xf32>
    %12 = arith.truncf %11 : vector<16x128xf32> to vector<16x128xbf16>
    %c1 = arith.constant 1 : index
    %c0_5 = arith.constant 0 : index
    %c0_6 = arith.constant 0 : index
    %13 = vector.load %arg2[%c1, %c0_5, %c0_6] : memref<2x128x128xbf16, #tpu.memory_space<vmem>>, vector<1x128x128xbf16>
    %14 = vector.shape_cast %13 : vector<1x128x128xbf16> to vector<128x128xbf16>
    %cst_7 = arith.constant dense<0.000000e+00> : vector<16x128xf32>
    %15 = tpu.matmul %12, %14, %cst_7 {dimension_numbers = #tpu.dot_dimension_numbers<[1], [0], [0], [1], [0, 0, 1, 1], [], []>} : vector<16x128xbf16>, vector<128x128xbf16>, vector<16x128xf32> -> vector<16x128xf32>
    %16 = arith.negf %15 : vector<16x128xf32>
    %17 = math.exp %16 : vector<16x128xf32>
    %cst_8 = arith.constant 1.000000e+00 : f32
    %18 = vector.broadcast %cst_8 : f32 to vector<16x128xf32>
    %19 = arith.addf %18, %17 : vector<16x128xf32>
    %20 = arith.divf %18, %19 : vector<16x128xf32>
    %21 = arith.mulf %15, %20 : vector<16x128xf32>
    %22 = arith.addf %11, %21 : vector<16x128xf32>
    %c0_9 = arith.constant 0 : index
    %c0_10 = arith.constant 0 : index
    %23 = vector.load %arg3[%c0_9, %c0_10] : memref<16x128xf32, #tpu.memory_space<vmem>>, vector<16x128xf32>
    tpu.vector_store %arg3[%c0_9, %c0_10], %22 {strides = array<i32>} : memref<16x128xf32, #tpu.memory_space<vmem>>, vector<16x128xf32>,
    return
  }
  func.func @transform_0(%arg0: i32) -> (i32, i32) {
    %c0_i32 = arith.constant 0 : i32
    %c0_i32_0 = arith.constant 0 : i32
    return %arg0, %c0_i32 : i32, i32
  }
  func.func @transform_1(%arg0: i32) -> (i32, i32, i32) {
    %c0_i32 = arith.constant 0 : i32
    %c0_i32_0 = arith.constant 0 : i32
    %c0_i32_1 = arith.constant 0 : i32
    %c0_i32_2 = arith.constant 0 : i32
    return %c0_i32, %c0_i32_0, %c0_i32_1 : i32, i32, i32
  }
  func.func @transform_2(%arg0: i32) -> (i32, i32) {
    %c0_i32 = arith.constant 0 : i32
    %c0_i32_0 = arith.constant 0 : i32
    return %arg0, %c0_i32 : i32, i32
  }
}

</mosaic_0001>

<bundles_post_ra>
// kernel: tpu_custom_call.1
= control target key start
LH: loop header
LB: loop body
LE: loop exit
PB: predicated region body
PF: predicated region fallthrough
CT: control target
= control target key end

     0   :  { %7 = vsyncpa [#allocation3], 0  ;;  %s565_s0 = inlined_call_operand.hbm [shape: f32[16,128], index: 0, kind: input, shape index: {}]   ;;  %s566_s1 = inlined_call_operand.hbm [shape: bf16[2,128,128], index: 1, kind: input, shape index: {}]   ;;  %s567_s2 = inlined_call_operand.hbm [shape: f32[16,128], index: 2, kind: output, shape index: {}]  }
   0x1   :  { %8 = vsyncpa [#allocation6], 0 }
   0x2   :  { %9 = vsyncpa [#allocation4], 0  ;;  %s499_s9 = smov [#allocation2]   ;;  %s427_s13 = scalar_lea.hbm %s565_s0, 256 }
   0x3   :  { %s15_s10 = sshll.u32 %s499_s9, 4  ;;  %p428_p0 = scmp.ne.s32.totalorder %s565_s0, %s427_s13  ;;  %s16_s10 = int_to_ptr.vmem [resolvable:$true] %s15_s10 }
   0x4   :  { %p431_p1 = scmp.lt.u32.totalorder %s427_s13, %s565_s0 }
   0x6   :  { %p433_p2 = pnand %p431_p1, %p428_p0 }
   0x8   :  { %436 = shalt.err (!%p433_p2)
}
   0x9   :  { %s437_s18 = scalar_lea.vmem %s16_s10, 256  ;;  %p442_p4 = scmp.lt.s32.totalorder %s16_s10, %s16_s10 }
   0xa   :  { %p438_p3 = scmp.ne.s32.totalorder %s16_s10, %s437_s18  ;;  %p443_p5 = scmp.lt.s32.totalorder %s437_s18, %s437_s18 }
   0xc   :  { %p444_p6 = por %p443_p5, %p442_p4 }
   0xe   :  { %p445_p7 = pnand %p444_p6, %p438_p3 }
  0x10   :  { %448 = shalt.err (!%p445_p7)
}
  0x11   :  { %s500_s19 = smov 128   ;;  %s501_s20 = smov 8  }
  0x12   :  { %21 = dma.hbm_to_vmem [thread:$0]  %s565_s0, 256, %s16_s10, [#allocation3], %s500_s19, %s500_s19, %s501_s20  }
  0x13   :  { %s502_s23 = smov [#allocation5]   ;;  %s449_s27 = scalar_lea.hbm %s566_s1, 2048 }
  0x14   :  { %s27_s24 = sshll.u32 %s502_s23, 4  ;;  %p450_p8 = scmp.ne.s32.totalorder %s566_s1, %s449_s27  ;;  %s28_s24 = int_to_ptr.vmem [resolvable:$true] %s27_s24 }
  0x15   :  { %p453_p9 = scmp.lt.u32.totalorder %s449_s27, %s566_s1 }
  0x17   :  { %p455_p10 = pnand %p453_p9, %p450_p8 }
  0x19   :  { %458 = shalt.err (!%p455_p10)
}
  0x1a   :  { %s459_s4 = scalar_lea.vmem %s28_s24, 2048  ;;  %p464_p12 = scmp.lt.s32.totalorder %s28_s24, %s28_s24 }
  0x1b   :  { %p460_p11 = scmp.ne.s32.totalorder %s28_s24, %s459_s4  ;;  %p465_p13 = scmp.lt.s32.totalorder %s459_s4, %s459_s4 }
  0x1d   :  { %p466_p0 = por %p465_p13, %p464_p12 }
  0x1f   :  { %p467_p1 = pnand %p466_p0, %p460_p11 }
  0x21   :  { %470 = shalt.err (!%p467_p1)
}
  0x22   :  { %s503_s0 = smov 64   ;;  %s504_s5 = smov 4  }
  0x23   :  { %33 = dma.hbm_to_vmem [thread:$0]  %s566_s1, 2048, %s28_s24, [#allocation6], %s503_s0, %s503_s0, %s504_s5  }
  0x24   :  { %493 = dma.done.wait [#allocation3], 256  }
  0x25   :  { %494 = vsyncadd [#allocation3], 4294967040 }
  0x26   :  { %495 = dma.done.wait [#allocation6], 2048  }
  0x27   :  { %496 = vsyncadd [#allocation6], 4294965248  ;;  %v505_v0 = vmov 0.0   ;;  %vm506_vm0 = vmmov 0   ;;  %v395_v1 = vld [vmem:[#allocation5] sm:$0xff]   ;;  %v396_v2 = vld [vmem:[#allocation5 + $0x8] sm:$0xff]  }
  0x28   :  { %346 = vmatprep.subr.bf16.mxu0 %v505_v0  ;;  %362 = vmatprep.mubr.msk.bf16.mxu0 %vm506_vm0, %v505_v0  ;;  %v397_v3 = vld [vmem:[#allocation5 + $0x10] sm:$0xff]   ;;  %v398_v4 = vld [vmem:[#allocation5 + $0x18] sm:$0xff]   ;;  %v399_v5 = vld [vmem:[#allocation5 + $0x20] sm:$0xff]   ;;  %s507_s1 = smov [#allocation7]  }
  0x29   :  { %366 = vmatprep.subr.bf16.mxu1 %v505_v0  ;;  %382 = vmatprep.mubr.msk.bf16.mxu1 %vm506_vm0, %v505_v0  ;;  %v400_v6 = vld [vmem:[#allocation5 + $0x28] sm:$0xff]   ;;  %v401_v7 = vld [vmem:[#allocation5 + $0x30] sm:$0xff]   ;;  %v402_v8 = vld [vmem:[#allocation5 + $0x38] sm:$0xff]   ;;  %s295_s8 = sshll.u32 %s507_s1, 4  ;;  %s296_s8 = int_to_ptr.vmem [resolvable:$true] %s295_s8 }
  0x2a   :  { %347 = vmatpush3.bf16.msra.mxu0 %v395_v1  ;;  %v41_v9 = vld [vmem:[#allocation2] sm:$0xff]  ;;  %v42_v10 = vld [vmem:[#allocation2 + $0x8] sm:$0xff]  ;;  %v403_v12 = vld [vmem:[#allocation5 + $0x40] sm:$0xff]   ;;  %s471_s9 = scalar_lea.vmem %s296_s8, 256  ;;  %p476_p3 = scmp.lt.s32.totalorder %s296_s8, %s296_s8 }
  0x2b   :  { %348 = vmatprep.subr.bf16.mxu0 %v505_v0  ;;  %v43_v11 = vpack.c.bf16 %v42_v10, %v41_v9  ;;  %367 = vmatpush3.bf16.msra.mxu1 %v403_v12  ;;  %v404_v13 = vld [vmem:[#allocation5 + $0x48] sm:$0xff]   ;;  %v405_v14 = vld [vmem:[#allocation5 + $0x50] sm:$0xff]   ;;  %v406_v15 = vld [vmem:[#allocation5 + $0x58] sm:$0xff]   ;;  %p472_p2 = scmp.ne.s32.totalorder %s296_s8, %s471_s9  ;;  %p477_p4 = scmp.lt.s32.totalorder %s471_s9, %s471_s9 }
  0x2c   :  { %368 = vmatprep.subr.bf16.mxu1 %v505_v0  ;;  %v407_v16 = vld [vmem:[#allocation5 + $0x60] sm:$0xff]   ;;  %v408_v17 = vld [vmem:[#allocation5 + $0x68] sm:$0xff]   ;;  %v409_v18 = vld [vmem:[#allocation5 + $0x70] sm:$0xff]  }
  0x2d   :  { %v410_v19 = vld [vmem:[#allocation5 + $0x78] sm:$0xff]   ;;  %p478_p5 = por %p477_p4, %p476_p3 }
  0x2e   :  { %349 = vmatpush3.bf16.msra.mxu0 %v396_v2 }
  0x2f   :  { %350 = vmatprep.subr.bf16.mxu0 %v505_v0  ;;  %369 = vmatpush3.bf16.msra.mxu1 %v404_v13  ;;  %p479_p6 = pnand %p478_p5, %p472_p2 }
  0x30   :  { %370 = vmatprep.subr.bf16.mxu1 %v505_v0 }
  0x32   :  { %351 = vmatpush3.bf16.msra.mxu0 %v397_v3 }
  0x33   :  { %352 = vmatprep.subr.bf16.mxu0 %v505_v0  ;;  %371 = vmatpush3.bf16.msra.mxu1 %v405_v14 }
  0x34   :  { %372 = vmatprep.subr.bf16.mxu1 %v505_v0 }
  0x36   :  { %353 = vmatpush3.bf16.msra.mxu0 %v398_v4 }
  0x37   :  { %354 = vmatprep.subr.bf16.mxu0 %v505_v0  ;;  %373 = vmatpush3.bf16.msra.mxu1 %v406_v15 }
  0x38   :  { %374 = vmatprep.subr.bf16.mxu1 %v505_v0 }
  0x3a   :  { %355 = vmatpush3.bf16.msra.mxu0 %v399_v5 }
  0x3b   :  { %356 = vmatprep.subr.bf16.mxu0 %v505_v0  ;;  %375 = vmatpush3.bf16.msra.mxu1 %v407_v16 }
  0x3c   :  { %376 = vmatprep.subr.bf16.mxu1 %v505_v0 }
  0x3e   :  { %357 = vmatpush3.bf16.msra.mxu0 %v400_v6 }
  0x3f   :  { %358 = vmatprep.subr.bf16.mxu0 %v505_v0  ;;  %377 = vmatpush3.bf16.msra.mxu1 %v408_v17 }
  0x40   :  { %378 = vmatprep.subr.bf16.mxu1 %v505_v0 }
  0x42   :  { %359 = vmatpush3.bf16.msra.mxu0 %v401_v7 }
  0x43   :  { %360 = vmatprep.subr.bf16.mxu0 %v505_v0  ;;  %379 = vmatpush3.bf16.msra.mxu1 %v409_v18 }
  0x44   :  { %380 = vmatprep.subr.bf16.mxu1 %v505_v0 }
  0x46   :  { %361 = vmatpush3.bf16.msra.mxu0 %v402_v8 }
  0x47   :  { %381 = vmatpush3.bf16.msra.mxu1 %v410_v19 }
  0x49   :  { %363 = vmatmul.mubr.bf16.vlgmr.msra.gmra.mrb[0].mxu0 %v43_v11 }
 0x11c   :  { %v142_v20 = vpop.f32.mrb[0].mxu0 }
 0x11d   :  { %v316_v21 = vmul.f32 -1.442695, %v142_v20  ;;  %v364_v22 = vpop.f32.mrb[1].mxu0 }
 0x11e   :  { %v145_v23 = vpop.f32.mrb[2].mxu0 }
 0x11f   :  { %411 = vpow2.f32 %v316_v21  ;;  %v317_v24 = vmul.f32 -1.442695, %v145_v23  ;;  %v365_v25 = vpop.f32.mrb[3].mxu0 }
 0x121   :  { %413 = vpow2.f32 %v317_v24 }
 0x129   :  { %v412_v26 = vpop.eup %411 }
 0x12a   :  { %v155_v27 = vadd.f32 1.0, %v412_v26 }
 0x12b   :  { %v414_v28 = vpop.eup %413 }
 0x12c   :  { %415 = vrcp.f32 %v155_v27  ;;  %v156_v29 = vadd.f32 1.0, %v414_v28 }
 0x12e   :  { %417 = vrcp.f32 %v156_v29 }
 0x136   :  { %v416_v30 = vpop.eup %415 }
 0x137   :  { %v161_v31 = vmul.f32 %v416_v30, %v142_v20 }
 0x138   :  { %v418_v32 = vpop.eup %417 }
 0x139   :  { %v162_v33 = vmul.f32 %v418_v32, %v145_v23  ;;  %v163_v34 = vadd.f32 %v161_v31, %v41_v9 }
 0x13b   :  { %v164_v35 = vadd.f32 %v162_v33, %v42_v10 }
 0x13d   :  { %v165_v36 = vpack.c.bf16 %v164_v35, %v163_v34 }
 0x13f   :  { %383 = vmatmul.mubr.bf16.vlgmr.msra.gmra.mrb[0].mxu1 %v165_v36 }
 0x212   :  { %v265_v37 = vpop.f32.mrb[0].mxu1 }
 0x213   :  { %v326_v38 = vmul.f32 -1.442695, %v265_v37  ;;  %v384_v39 = vpop.f32.mrb[1].mxu1 }
 0x214   :  { %v268_v40 = vpop.f32.mrb[2].mxu1 }
 0x215   :  { %419 = vpow2.f32 %v326_v38  ;;  %v327_v41 = vmul.f32 -1.442695, %v268_v40  ;;  %v385_v42 = vpop.f32.mrb[3].mxu1 }
 0x217   :  { %421 = vpow2.f32 %v327_v41 }
 0x21f   :  { %v420_v43 = vpop.eup %419 }
 0x220   :  { %v278_v44 = vadd.f32 1.0, %v420_v43 }
 0x221   :  { %v422_v45 = vpop.eup %421 }
 0x222   :  { %423 = vrcp.f32 %v278_v44  ;;  %v279_v46 = vadd.f32 1.0, %v422_v45 }
 0x224   :  { %425 = vrcp.f32 %v279_v46 }
 0x22c   :  { %v424_v47 = vpop.eup %423 }
 0x22d   :  { %v284_v48 = vmul.f32 %v424_v47, %v265_v37 }
 0x22e   :  { %v426_v49 = vpop.eup %425 }
 0x22f   :  { %v286_v50 = vadd.f32 %v284_v48, %v163_v34  ;;  %v285_v51 = vmul.f32 %v426_v49, %v268_v40 }
 0x231   :  { %288 = vst [vmem:[#allocation7] sm:$0xff] %v286_v50  ;;  %v287_v52 = vadd.f32 %v285_v51, %v164_v35 }
 0x233   :  { %289 = vst [vmem:[#allocation7 + $0x8] sm:$0xff] %v287_v52 }
 0x234   :  { %482 = shalt.err (!%p479_p6)
}
 0x235   :  { %s483_s12 = scalar_lea.hbm %s567_s2, 256 }
 0x236   :  { %p484_p7 = scmp.ne.s32.totalorder %s567_s2, %s483_s12  ;;  %p487_p8 = scmp.lt.u32.totalorder %s483_s12, %s567_s2 }
 0x238   :  { %p489_p9 = pnand %p487_p8, %p484_p7 }
 0x23a   :  { %492 = shalt.err (!%p489_p9)
}
 0x23b   :  { %301 = dma.vmem_to_hbm [thread:$0]  %s296_s8, 256, %s567_s2, [#allocation4], %s500_s19, %s500_s19, %s501_s20  }
 0x23c   :  { %497 = dma.done.wait [#allocation4], 256  }
 0x23d   :  { %498 = vsyncadd [#allocation4], 4294967040 }
 0x23e   :  { %305 = vsyncpa [#allocation3], 1 }
 0x23f   :  { %306 = vsyncpa [#allocation6], 1 }
 0x240   :  { %307 = vsyncpa [#allocation4], 1 }

// kernel: tpu_custom_call.1
= control target key start
LH: loop header
LB: loop body
LE: loop exit
PB: predicated region body
PF: predicated region fallthrough
CT: control target
= control target key end

     0   :  { %7 = vsyncpa [#allocation3], 0  ;;  %s565_s0 = inlined_call_operand.hbm [shape: f32[16,128], index: 0, kind: input, shape index: {}]   ;;  %s566_s1 = inlined_call_operand.hbm [shape: bf16[2,128,128], index: 1, kind: input, shape index: {}]   ;;  %s567_s2 = inlined_call_operand.hbm [shape: f32[16,128], index: 2, kind: output, shape index: {}]  }
   0x1   :  { %8 = vsyncpa [#allocation6], 0 }
   0x2   :  { %9 = vsyncpa [#allocation4], 0  ;;  %s499_s9 = smov [#allocation2]   ;;  %s427_s13 = scalar_lea.hbm %s565_s0, 256 }
   0x3   :  { %s15_s10 = sshll.u32 %s499_s9, 4  ;;  %p428_p0 = scmp.ne.s32.totalorder %s565_s0, %s427_s13  ;;  %s16_s10 = int_to_ptr.vmem [resolvable:$true] %s15_s10 }
   0x4   :  { %p431_p1 = scmp.lt.u32.totalorder %s427_s13, %s565_s0 }
   0x6   :  { %p433_p2 = pnand %p431_p1, %p428_p0 }
   0x8   :  { %436 = shalt.err (!%p433_p2)
}
   0x9   :  { %s437_s18 = scalar_lea.vmem %s16_s10, 256  ;;  %p442_p4 = scmp.lt.s32.totalorder %s16_s10, %s16_s10 }
   0xa   :  { %p438_p3 = scmp.ne.s32.totalorder %s16_s10, %s437_s18  ;;  %p443_p5 = scmp.lt.s32.totalorder %s437_s18, %s437_s18 }
   0xc   :  { %p444_p6 = por %p443_p5, %p442_p4 }
   0xe   :  { %p445_p7 = pnand %p444_p6, %p438_p3 }
  0x10   :  { %448 = shalt.err (!%p445_p7)
}
  0x11   :  { %s500_s19 = smov 128   ;;  %s501_s20 = smov 8  }
  0x12   :  { %21 = dma.hbm_to_vmem [thread:$0]  %s565_s0, 256, %s16_s10, [#allocation3], %s500_s19, %s500_s19, %s501_s20  }
  0x13   :  { %s502_s23 = smov [#allocation5]   ;;  %s449_s27 = scalar_lea.hbm %s566_s1, 2048 }
  0x14   :  { %s27_s24 = sshll.u32 %s502_s23, 4  ;;  %p450_p8 = scmp.ne.s32.totalorder %s566_s1, %s449_s27  ;;  %s28_s24 = int_to_ptr.vmem [resolvable:$true] %s27_s24 }
  0x15   :  { %p453_p9 = scmp.lt.u32.totalorder %s449_s27, %s566_s1 }
  0x17   :  { %p455_p10 = pnand %p453_p9, %p450_p8 }
  0x19   :  { %458 = shalt.err (!%p455_p10)
}
  0x1a   :  { %s459_s4 = scalar_lea.vmem %s28_s24, 2048  ;;  %p464_p12 = scmp.lt.s32.totalorder %s28_s24, %s28_s24 }
  0x1b   :  { %p460_p11 = scmp.ne.s32.totalorder %s28_s24, %s459_s4  ;;  %p465_p13 = scmp.lt.s32.totalorder %s459_s4, %s459_s4 }
  0x1d   :  { %p466_p0 = por %p465_p13, %p464_p12 }
  0x1f   :  { %p467_p1 = pnand %p466_p0, %p460_p11 }
  0x21   :  { %470 = shalt.err (!%p467_p1)
}
  0x22   :  { %s503_s0 = smov 64   ;;  %s504_s5 = smov 4  }
  0x23   :  { %33 = dma.hbm_to_vmem [thread:$0]  %s566_s1, 2048, %s28_s24, [#allocation6], %s503_s0, %s503_s0, %s504_s5  }
  0x24   :  { %493 = dma.done.wait [#allocation3], 256  }
  0x25   :  { %494 = vsyncadd [#allocation3], 4294967040 }
  0x26   :  { %495 = dma.done.wait [#allocation6], 2048  }
  0x27   :  { %496 = vsyncadd [#allocation6], 4294965248  ;;  %v505_v0 = vmov 0.0   ;;  %vm506_vm0 = vmmov 0   ;;  %v395_v1 = vld [vmem:[#allocation5] sm:$0xff]   ;;  %v396_v2 = vld [vmem:[#allocation5 + $0x8] sm:$0xff]  }
  0x28   :  { %346 = vmatprep.subr.bf16.mxu0 %v505_v0  ;;  %362 = vmatprep.mubr.msk.bf16.mxu0 %vm506_vm0, %v505_v0  ;;  %v397_v3 = vld [vmem:[#allocation5 + $0x10] sm:$0xff]   ;;  %v398_v4 = vld [vmem:[#allocation5 + $0x18] sm:$0xff]   ;;  %v399_v5 = vld [vmem:[#allocation5 + $0x20] sm:$0xff]   ;;  %s507_s1 = smov [#allocation7]  }
  0x29   :  { %366 = vmatprep.subr.bf16.mxu1 %v505_v0  ;;  %382 = vmatprep.mubr.msk.bf16.mxu1 %vm506_vm0, %v505_v0  ;;  %v400_v6 = vld [vmem:[#allocation5 + $0x28] sm:$0xff]   ;;  %v401_v7 = vld [vmem:[#allocation5 + $0x30] sm:$0xff]   ;;  %v402_v8 = vld [vmem:[#allocation5 + $0x38] sm:$0xff]   ;;  %s295_s8 = sshll.u32 %s507_s1, 4  ;;  %s296_s8 = int_to_ptr.vmem [resolvable:$true] %s295_s8 }
  0x2a   :  { %347 = vmatpush3.bf16.msra.mxu0 %v395_v1  ;;  %v41_v9 = vld [vmem:[#allocation2] sm:$0xff]  ;;  %v42_v10 = vld [vmem:[#allocation2 + $0x8] sm:$0xff]  ;;  %v403_v12 = vld [vmem:[#allocation5 + $0x40] sm:$0xff]   ;;  %s471_s9 = scalar_lea.vmem %s296_s8, 256  ;;  %p476_p3 = scmp.lt.s32.totalorder %s296_s8, %s296_s8 }
  0x2b   :  { %348 = vmatprep.subr.bf16.mxu0 %v505_v0  ;;  %v43_v11 = vpack.c.bf16 %v42_v10, %v41_v9  ;;  %367 = vmatpush3.bf16.msra.mxu1 %v403_v12  ;;  %v404_v13 = vld [vmem:[#allocation5 + $0x48] sm:$0xff]   ;;  %v405_v14 = vld [vmem:[#allocation5 + $0x50] sm:$0xff]   ;;  %v406_v15 = vld [vmem:[#allocation5 + $0x58] sm:$0xff]   ;;  %p472_p2 = scmp.ne.s32.totalorder %s296_s8, %s471_s9  ;;  %p477_p4 = scmp.lt.s32.totalorder %s471_s9, %s471_s9 }
  0x2c   :  { %368 = vmatprep.subr.bf16.mxu1 %v505_v0  ;;  %v407_v16 = vld [vmem:[#allocation5 + $0x60] sm:$0xff]   ;;  %v408_v17 = vld [vmem:[#allocation5 + $0x68] sm:$0xff]   ;;  %v409_v18 = vld [vmem:[#allocation5 + $0x70] sm:$0xff]  }
  0x2d   :  { %v410_v19 = vld [vmem:[#allocation5 + $0x78] sm:$0xff]   ;;  %p478_p5 = por %p477_p4, %p476_p3 }
  0x2e   :  { %349 = vmatpush3.bf16.msra.mxu0 %v396_v2 }
  0x2f   :  { %350 = vmatprep.subr.bf16.mxu0 %v505_v0  ;;  %369 = vmatpush3.bf16.msra.mxu1 %v404_v13  ;;  %p479_p6 = pnand %p478_p5, %p472_p2 }
  0x30   :  { %370 = vmatprep.subr.bf16.mxu1 %v505_v0 }
  0x32   :  { %351 = vmatpush3.bf16.msra.mxu0 %v397_v3 }
  0x33   :  { %352 = vmatprep.subr.bf16.mxu0 %v505_v0  ;;  %371 = vmatpush3.bf16.msra.mxu1 %v405_v14 }
  0x34   :  { %372 = vmatprep.subr.bf16.mxu1 %v505_v0 }
  0x36   :  { %353 = vmatpush3.bf16.msra.mxu0 %v398_v4 }
  0x37   :  { %354 = vmatprep.subr.bf16.mxu0 %v505_v0  ;;  %373 = vmatpush3.bf16.msra.mxu1 %v406_v15 }
  0x38   :  { %374 = vmatprep.subr.bf16.mxu1 %v505_v0 }
  0x3a   :  { %355 = vmatpush3.bf16.msra.mxu0 %v399_v5 }
  0x3b   :  { %356 = vmatprep.subr.bf16.mxu0 %v505_v0  ;;  %375 = vmatpush3.bf16.msra.mxu1 %v407_v16 }
  0x3c   :  { %376 = vmatprep.subr.bf16.mxu1 %v505_v0 }
  0x3e   :  { %357 = vmatpush3.bf16.msra.mxu0 %v400_v6 }
  0x3f   :  { %358 = vmatprep.subr.bf16.mxu0 %v505_v0  ;;  %377 = vmatpush3.bf16.msra.mxu1 %v408_v17 }
  0x40   :  { %378 = vmatprep.subr.bf16.mxu1 %v505_v0 }
  0x42   :  { %359 = vmatpush3.bf16.msra.mxu0 %v401_v7 }
  0x43   :  { %360 = vmatprep.subr.bf16.mxu0 %v505_v0  ;;  %379 = vmatpush3.bf16.msra.mxu1 %v409_v18 }
  0x44   :  { %380 = vmatprep.subr.bf16.mxu1 %v505_v0 }
  0x46   :  { %361 = vmatpush3.bf16.msra.mxu0 %v402_v8 }
  0x47   :  { %381 = vmatpush3.bf16.msra.mxu1 %v410_v19 }
  0x49   :  { %363 = vmatmul.mubr.bf16.vlgmr.msra.gmra.mrb[0].mxu0 %v43_v11 }
 0x11c   :  { %v142_v20 = vpop.f32.mrb[0].mxu0 }
 0x11d   :  { %v316_v21 = vmul.f32 -1.442695, %v142_v20  ;;  %v364_v22 = vpop.f32.mrb[1].mxu0 }
 0x11e   :  { %v145_v23 = vpop.f32.mrb[2].mxu0 }
 0x11f   :  { %411 = vpow2.f32 %v316_v21  ;;  %v317_v24 = vmul.f32 -1.442695, %v145_v23  ;;  %v365_v25 = vpop.f32.mrb[3].mxu0 }
 0x121   :  { %413 = vpow2.f32 %v317_v24 }
 0x129   :  { %v412_v26 = vpop.eup %411 }
 0x12a   :  { %v155_v27 = vadd.f32 1.0, %v412_v26 }
 0x12b   :  { %v414_v28 = vpop.eup %413 }
 0x12c   :  { %415 = vrcp.f32 %v155_v27  ;;  %v156_v29 = vadd.f32 1.0, %v414_v28 }
 0x12e   :  { %417 = vrcp.f32 %v156_v29 }
 0x136   :  { %v416_v30 = vpop.eup %415 }
 0x137   :  { %v161_v31 = vmul.f32 %v416_v30, %v142_v20 }
 0x138   :  { %v418_v32 = vpop.eup %417 }
 0x139   :  { %v162_v33 = vmul.f32 %v418_v32, %v145_v23  ;;  %v163_v34 = vadd.f32 %v161_v31, %v41_v9 }
 0x13b   :  { %v164_v35 = vadd.f32 %v162_v33, %v42_v10 }
 0x13d   :  { %v165_v36 = vpack.c.bf16 %v164_v35, %v163_v34 }
 0x13f   :  { %383 = vmatmul.mubr.bf16.vlgmr.msra.gmra.mrb[0].mxu1 %v165_v36 }
 0x212   :  { %v265_v37 = vpop.f32.mrb[0].mxu1 }
 0x213   :  { %v326_v38 = vmul.f32 -1.442695, %v265_v37  ;;  %v384_v39 = vpop.f32.mrb[1].mxu1 }
 0x214   :  { %v268_v40 = vpop.f32.mrb[2].mxu1 }
 0x215   :  { %419 = vpow2.f32 %v326_v38  ;;  %v327_v41 = vmul.f32 -1.442695, %v268_v40  ;;  %v385_v42 = vpop.f32.mrb[3].mxu1 }
 0x217   :  { %421 = vpow2.f32 %v327_v41 }
 0x21f   :  { %v420_v43 = vpop.eup %419 }
 0x220   :  { %v278_v44 = vadd.f32 1.0, %v420_v43 }
 0x221   :  { %v422_v45 = vpop.eup %421 }
 0x222   :  { %423 = vrcp.f32 %v278_v44  ;;  %v279_v46 = vadd.f32 1.0, %v422_v45 }
 0x224   :  { %425 = vrcp.f32 %v279_v46 }
 0x22c   :  { %v424_v47 = vpop.eup %423 }
 0x22d   :  { %v284_v48 = vmul.f32 %v424_v47, %v265_v37 }
 0x22e   :  { %v426_v49 = vpop.eup %425 }
 0x22f   :  { %v286_v50 = vadd.f32 %v284_v48, %v163_v34  ;;  %v285_v51 = vmul.f32 %v426_v49, %v268_v40 }
 0x231   :  { %288 = vst [vmem:[#allocation7] sm:$0xff] %v286_v50  ;;  %v287_v52 = vadd.f32 %v285_v51, %v164_v35 }
 0x233   :  { %289 = vst [vmem:[#allocation7 + $0x8] sm:$0xff] %v287_v52 }
 0x234   :  { %482 = shalt.err (!%p479_p6)
}
 0x235   :  { %s483_s12 = scalar_lea.hbm %s567_s2, 256 }
 0x236   :  { %p484_p7 = scmp.ne.s32.totalorder %s567_s2, %s483_s12  ;;  %p487_p8 = scmp.lt.u32.totalorder %s483_s12, %s567_s2 }
 0x238   :  { %p489_p9 = pnand %p487_p8, %p484_p7 }
 0x23a   :  { %492 = shalt.err (!%p489_p9)
}
 0x23b   :  { %301 = dma.vmem_to_hbm [thread:$0]  %s296_s8, 256, %s567_s2, [#allocation4], %s500_s19, %s500_s19, %s501_s20  }
 0x23c   :  { %497 = dma.done.wait [#allocation4], 256  }
 0x23d   :  { %498 = vsyncadd [#allocation4], 4294967040 }
 0x23e   :  { %305 = vsyncpa [#allocation3], 1 }
 0x23f   :  { %306 = vsyncpa [#allocation6], 1 }
 0x240   :  { %307 = vsyncpa [#allocation4], 1 }

</bundles_post_ra>
